<compile_context>
chip_gen: v5e
topology: v5e:2x2
jax: 0.10.0
libtpu: 0.0.40
codegen_flags: <defaults>
</compile_context>

<pallas_src>
import functools

import jax
import jax.numpy as jnp
from jax import lax
from jax.experimental import pallas as pl
from jax.experimental.pallas import tpu as pltpu


def _round_up(x, m):
    return ((x + m - 1) // m) * m


def _cdiv(a, b):
    return (a + b - 1) // b


def _distill_kl_kernel(ys_ref, yt_ref, part_ref, *, inv_t, batch, tile_rows,
                       needs_row_mask):
    """One batch tile: emit the un-normalized partial KL sum for this tile.

    Algebraic form (uses sum_j p_t == 1, max-shifted exponentials):
      kl_row = (sum_j e_t * (yt_sh - ys_sh)) / d_t + log(d_s / d_t)
    which avoids materializing full log_p_s / log_p_t tiles.
    """
    ys = ys_ref[...].astype(jnp.float32)   # [tile_rows, C]
    yt = yt_ref[...].astype(jnp.float32)

    if needs_row_mask:
        # The last tile may extend past the batch; replace out-of-range rows
        # with identical zero rows (exactly zero KL contribution, robust to
        # whatever garbage the padded block region holds).
        row0 = pl.program_id(0) * tile_rows
        row_ids = row0 + lax.broadcasted_iota(jnp.int32, (tile_rows, 1), 0)
        valid = row_ids < batch
        ys = jnp.where(valid, ys, 0.0)
        yt = jnp.where(valid, yt, 0.0)

    inv_t = jnp.float32(inv_t)              # 1/T folded into one multiply
    ys = ys * inv_t
    yt = yt * inv_t

    # Max-shifted (numerically stable) softmax pieces along the class axis.
    m_s = jnp.max(ys, axis=1, keepdims=True)
    m_t = jnp.max(yt, axis=1, keepdims=True)
    ys_sh = ys - m_s
    yt_sh = yt - m_t

    d_s = jnp.sum(jnp.exp(ys_sh), axis=1, keepdims=True)
    e_t = jnp.exp(yt_sh)
    d_t = jnp.sum(e_t, axis=1, keepdims=True)
    row_dot = jnp.sum(e_t * (yt_sh - ys_sh), axis=1, keepdims=True)

    # Exact per-row divide ([tile_rows, 1] column -> negligible cost) and a
    # single fused log.
    kl_row = row_dot / d_t + jnp.log(d_s / d_t)

    kl_partial = jnp.sum(kl_row)
    # Lane-dense, (8,128)-aligned partial-sum block; wrapper reads [:, 0, 0].
    part_ref[...] = jnp.full(part_ref.shape, kl_partial, dtype=jnp.float32)


def distill_kl(y_s, y_t, temperature, *, block_rows=None):
    """Pallas implementation of DistillKL.forward. Returns a scalar f32 loss."""
    assert y_s.shape == y_t.shape and y_s.ndim == 2
    assert y_s.dtype == y_t.dtype
    B, C = y_s.shape
    itemsize = jnp.dtype(y_s.dtype).itemsize
    row_align = 8 if itemsize >= 4 else 16   # sublane packing for 2-byte dtypes

    # VMEM lays the class (lane) axis out padded to a multiple of 128.
    C_lanes = _round_up(C, 128)

    if block_rows is None:
        # Byte-based tile sizing against the f32 intermediates (~4 MiB per
        # input block): 2 inputs x 2 buffers x block + ~5 f32 temps stays
        # comfortably under the 48 MiB VMEM request on every generation.
        target_f32_block_bytes = 4 * 1024 * 1024
        rows_by_vmem = max(row_align,
                           (target_f32_block_bytes // (C_lanes * 4))
                           // row_align * row_align)
        # Prefer >= 2 tiles so the "parallel" grid axis shards across both
        # v7x TensorCores (free on single-TC v5e/v6e).
        rows_for_two_tiles = max(row_align, _round_up(_cdiv(B, 2), row_align))
        block_rows = min(rows_by_vmem, rows_for_two_tiles)

    tile_rows = max(row_align, (int(block_rows) // row_align) * row_align)
    if tile_rows >= B:
        tile_rows = B   # full-dim block (always legal), single tile, no mask

    num_tiles = _cdiv(B, tile_rows)
    needs_row_mask = (B % tile_rows) != 0

    kernel = functools.partial(
        _distill_kl_kernel,
        inv_t=1.0 / float(temperature),
        batch=B,
        tile_rows=tile_rows,
        needs_row_mask=needs_row_mask,
    )

    partials = pl.pallas_call(
        kernel,
        out_shape=jax.ShapeDtypeStruct((num_tiles, 8, 128), jnp.float32),
        grid=(num_tiles,),
        in_specs=[
            pl.BlockSpec((tile_rows, C), lambda i: (i, 0)),
            pl.BlockSpec((tile_rows, C), lambda i: (i, 0)),
        ],
        out_specs=pl.BlockSpec((1, 8, 128), lambda i: (i, 0, 0)),
        compiler_params=pltpu.CompilerParams(
            dimension_semantics=("parallel",),
            vmem_limit_bytes=48 * 1024 * 1024,
        ),
    )(y_s, y_t)

    T = jnp.float32(temperature)
    # Per-tile partials reduced here (keeps the grid race-free / parallel);
    # scale by T^2 / original batch once.
    return (jnp.sum(partials[:, 0, 0]) * (T * T) / jnp.float32(B)).astype(jnp.float32)


def _reference_distill_kl(y_s, y_t, temperature):
    T = temperature
    log_p_s = jax.nn.log_softmax(y_s / T, axis=1)
    p_t = jax.nn.softmax(y_t / T, axis=1)
    log_p_t = jax.nn.log_softmax(y_t / T, axis=1)
    return jnp.sum(p_t * (log_p_t - log_p_s)) * T ** 2 / y_s.shape[0]


if __name__ == "__main__":
    TEMPERATURE = 4.0
    key = jax.random.PRNGKey(0)
    k1, k2, k3, k4 = jax.random.split(key, 4)

    # Test 1: small f32 student/teacher logits (single tile, no masking).
    B, C = 8, 32
    y_s = jax.random.normal(k1, (B, C), dtype=jnp.float32)
    y_t = jax.random.normal(k2, (B, C), dtype=jnp.float32)
    loss = jax.jit(lambda a, b: distill_kl(a, b, TEMPERATURE))(y_s, y_t)
    loss = jax.block_until_ready(loss)
    ref = _reference_distill_kl(y_s, y_t, TEMPERATURE)
    assert jnp.allclose(loss, ref, rtol=1e-4, atol=1e-4), (loss, ref)

    # Test 2: bf16 logits, ragged class count (C % 128 != 0), forced
    # multi-tile grid with a partial last tile (exercises full-C lane blocks,
    # the in-kernel row mask and the parallel per-tile partials — all with no
    # wrapper-side padding copies).
    B2, C2 = 24, 200
    y_s2 = jax.random.normal(k3, (B2, C2), dtype=jnp.float32).astype(jnp.bfloat16)
    y_t2 = jax.random.normal(k4, (B2, C2), dtype=jnp.float32).astype(jnp.bfloat16)
    loss2 = jax.jit(
        lambda a, b: distill_kl(a, b, TEMPERATURE, block_rows=16))(y_s2, y_t2)
    loss2 = jax.block_until_ready(loss2)
    ref2 = _reference_distill_kl(
        y_s2.astype(jnp.float32), y_t2.astype(jnp.float32), TEMPERATURE)
    assert jnp.allclose(loss2, ref2, rtol=1e-3, atol=1e-3), (loss2, ref2)

    print("KERNEL_OK")
</pallas_src>

<mosaic_0001>
module attributes {stable_mosaic.version = 11 : i64} {
  func.func @_distill_kl_kernel(%arg0: i32, %arg1: memref<8x32xf32, #tpu.memory_space<vmem>>, %arg2: memref<8x32xf32, #tpu.memory_space<vmem>>, %arg3: memref<1x8x128xf32, #tpu.memory_space<vmem>>) attributes {dimension_semantics = [#tpu.dimension_semantics<parallel>], iteration_bounds = array<i64: 1>, scalar_prefetch = 0 : i64, scratch_operands = 0 : i64, tpu.core_type = #tpu.core_type<tc>, window_params = [{transform_indices = @transform_0, window_bounds = array<i64: 8, 32>}, {transform_indices = @transform_1, window_bounds = array<i64: 8, 32>}, {transform_indices = @transform_2, window_bounds = array<i64: 1, 8, 128>}]} {
    %c0 = arith.constant 0 : index
    %c0_0 = arith.constant 0 : index
    %0 = vector.load %arg1[%c0, %c0_0] : memref<8x32xf32, #tpu.memory_space<vmem>>, vector<8x32xf32>
    %c0_1 = arith.constant 0 : index
    %c0_2 = arith.constant 0 : index
    %1 = vector.load %arg2[%c0_1, %c0_2] : memref<8x32xf32, #tpu.memory_space<vmem>>, vector<8x32xf32>
    %cst = arith.constant 2.500000e-01 : f32
    %2 = vector.broadcast %cst : f32 to vector<8x32xf32>
    %3 = arith.mulf %0, %2 : vector<8x32xf32>
    %cst_3 = arith.constant 2.500000e-01 : f32
    %4 = vector.broadcast %cst_3 : f32 to vector<8x32xf32>
    %5 = arith.mulf %1, %4 : vector<8x32xf32>
    %cst_4 = arith.constant dense<0xFF800000> : vector<8xf32>
    %6 = vector.multi_reduction <maximumf>, %3, %cst_4 [1] : vector<8x32xf32> to vector<8xf32>
    %7 = vector.shape_cast %6 : vector<8xf32> to vector<8x1xf32>
    %cst_5 = arith.constant dense<0xFF800000> : vector<8xf32>
    %8 = vector.multi_reduction <maximumf>, %5, %cst_5 [1] : vector<8x32xf32> to vector<8xf32>
    %9 = vector.shape_cast %8 : vector<8xf32> to vector<8x1xf32>
    %10 = vector.broadcast %7 : vector<8x1xf32> to vector<8x32xf32>
    %11 = arith.subf %3, %10 : vector<8x32xf32>
    %12 = vector.broadcast %9 : vector<8x1xf32> to vector<8x32xf32>
    %13 = arith.subf %5, %12 : vector<8x32xf32>
    %14 = math.exp %11 : vector<8x32xf32>
    %cst_6 = arith.constant dense<0.000000e+00> : vector<8xf32>
    %15 = vector.multi_reduction <add>, %14, %cst_6 [1] : vector<8x32xf32> to vector<8xf32>
    %16 = vector.shape_cast %15 : vector<8xf32> to vector<8x1xf32>
    %17 = math.exp %13 : vector<8x32xf32>
    %cst_7 = arith.constant dense<0.000000e+00> : vector<8xf32>
    %18 = vector.multi_reduction <add>, %17, %cst_7 [1] : vector<8x32xf32> to vector<8xf32>
    %19 = vector.shape_cast %18 : vector<8xf32> to vector<8x1xf32>
    %20 = arith.subf %13, %11 : vector<8x32xf32>
    %21 = arith.mulf %17, %20 : vector<8x32xf32>
    %cst_8 = arith.constant dense<0.000000e+00> : vector<8xf32>
    %22 = vector.multi_reduction <add>, %21, %cst_8 [1] : vector<8x32xf32> to vector<8xf32>
    %23 = vector.shape_cast %22 : vector<8xf32> to vector<8x1xf32>
    %24 = arith.divf %23, %19 : vector<8x1xf32>
    %25 = arith.divf %16, %19 : vector<8x1xf32>
    %26 = math.log %25 : vector<8x1xf32>
    %27 = arith.addf %24, %26 : vector<8x1xf32>
    %28 = vector.shape_cast %27 : vector<8x1xf32> to vector<1x8x1xf32>
    %cst_9 = arith.constant dense<0.000000e+00> : vector<1xf32>
    %29 = vector.multi_reduction <add>, %28, %cst_9 [1, 2] : vector<1x8x1xf32> to vector<1xf32>
    %30 = vector.shape_cast %29 : vector<1xf32> to vector<1x1x1xf32>
    %31 = vector.extract %30[0, 0, 0] : f32 from vector<1x1x1xf32>
    %32 = vector.broadcast %31 : f32 to vector<1x8x128xf32>
    %c0_10 = arith.constant 0 : index
    %c0_11 = arith.constant 0 : index
    %c0_12 = arith.constant 0 : index
    %33 = vector.load %arg3[%c0_10, %c0_11, %c0_12] : memref<1x8x128xf32, #tpu.memory_space<vmem>>, vector<1x8x128xf32>
    tpu.vector_store %arg3[%c0_10, %c0_11, %c0_12], %32 {strides = array<i32>} : memref<1x8x128xf32, #tpu.memory_space<vmem>>, vector<1x8x128xf32>,
    return
  }
  func.func @transform_0(%arg0: i32) -> (i32, i32) {
    %c0_i32 = arith.constant 0 : i32
    %c0_i32_0 = arith.constant 0 : i32
    return %arg0, %c0_i32 : i32, i32
  }
  func.func @transform_1(%arg0: i32) -> (i32, i32) {
    %c0_i32 = arith.constant 0 : i32
    %c0_i32_0 = arith.constant 0 : i32
    return %arg0, %c0_i32 : i32, i32
  }
  func.func @transform_2(%arg0: i32) -> (i32, i32, i32) {
    %c0_i32 = arith.constant 0 : i32
    %c0_i32_0 = arith.constant 0 : i32
    %c0_i32_1 = arith.constant 0 : i32
    return %arg0, %c0_i32, %c0_i32_0 : i32, i32, i32
  }
}

</mosaic_0001>

<bundles_post_ra>
// kernel: _lambda_.1
= control target key start
LH: loop header
LB: loop body
LE: loop exit
PB: predicated region body
PF: predicated region fallthrough
CT: control target
= control target key end

     0   :  { %7 = vsyncpa [#allocation3], 0  ;;  %s200_s0 = inlined_call_operand.hbm [shape: f32[8,32], index: 0, kind: input, shape index: {}]   ;;  %s201_s1 = inlined_call_operand.hbm [shape: f32[8,32], index: 1, kind: input, shape index: {}]   ;;  %s202_s2 = inlined_call_operand.vmem [shape: f32[1,8,128], index: 2, kind: output, shape index: {}]  }
   0x1   :  { %s14_s11 = sshll.u32 %s200_s0, 4  ;;  %s15_s11 = int_to_ptr.hbm [resolvable:$true] %s14_s11 }
   0x2   :  { %8 = vsyncpa [#allocation5], 0  ;;  %s169_s12 = smov [#allocation2]   ;;  %s25_s16 = sshll.u32 %s201_s1, 4  ;;  %s26_s16 = int_to_ptr.hbm [resolvable:$true] %s25_s16 }
   0x3   :  { %s16_s13 = sshll.u32 %s169_s12, 4  ;;  %s170_s17 = smov [#allocation4]   ;;  %s17_s13 = int_to_ptr.vmem [resolvable:$true] %s16_s13 }
   0x4   :  { %19 = dma.hbm_to_vmem [thread:$0]  %s15_s11, 128, %s17_s13, [#allocation3]  }
   0x5   :  { %s27_s18 = sshll.u32 %s170_s17, 4  ;;  %s28_s18 = int_to_ptr.vmem [resolvable:$true] %s27_s18 }
   0x6   :  { %30 = dma.hbm_to_vmem [thread:$0]  %s26_s16, 128, %s28_s18, [#allocation5]  }
   0x7   :  { %165 = dma.done.wait [#allocation3], 128  }
   0x8   :  { %166 = vsyncadd [#allocation3], 4294967168 }
   0x9   :  { %167 = dma.done.wait [#allocation5], 128  }
   0xa   :  { %168 = vsyncadd [#allocation5], 4294967168  ;;  %v40_v0 = vld [vmem:[#allocation4] sm:$0xff]  ;;  %vm43_vm0 = vcmask 261120   ;;  %v39_v2 = vld [vmem:[#allocation2] sm:$0xff]  ;;  %vm86_vm5 = vcmask 7168  }
   0xb   :  { %v42_v1 = vmul.f32 0.25, %v40_v0  ;;  %v41_v4 = vmul.f32 0.25, %v39_v2 }
   0xd   :  { %v47_v3 = vsel %vm43_vm0, %v42_v1, -inf  ;;  %v44_v5 = vsel %vm43_vm0, %v41_v4, -inf }
   0xe   :  { %48 = vmax.xlane.f32.xlu0 %v47_v3 }
  0x16   :  { %45 = vmax.xlane.f32.xlu0 %v44_v5 }
  0x81   :  { %v49_v6 = vpop.xlane.xlu0 %48 }
  0x82   :  { %v51_v7 = vsub.f32 %v42_v1, %v49_v6 }
  0x84   :  { %v57_v8 = vmul.f32 1.442695, %v51_v7 }
  0x86   :  { %109 = vpow2.f32 %v57_v8 }
  0x89   :  { %v46_v9 = vpop.xlane.xlu0 %45 }
  0x8a   :  { %v50_v10 = vsub.f32 %v41_v4, %v46_v9 }
  0x8c   :  { %v110_v11 = vpop.eup %109  ;;  %v52_v12 = vmul.f32 1.442695, %v50_v10  ;;  %v62_v13 = vsub.f32 %v51_v7, %v50_v10 }
  0x8d   :  { %v59_v14 = vsel %vm43_vm0, %v110_v11, 0.0 }
  0x8e   :  { %111 = vpow2.f32 %v52_v12  ;;  %60 = vadd.xlane.f32.xlu1 %v59_v14  ;;  %v63_v15 = vmul.f32 %v110_v11, %v62_v13 }
  0x90   :  { %v64_v16 = vsel %vm43_vm0, %v63_v15, 0.0 }
  0x91   :  { %65 = vadd.xlane.f32.xlu2 %v64_v16 }
  0x94   :  { %v112_v17 = vpop.eup %111 }
  0x95   :  { %v54_v18 = vsel %vm43_vm0, %v112_v17, 0.0 }
  0x96   :  { %55 = vadd.xlane.f32.xlu1 %v54_v18 }
 0x101   :  { %v61_v19 = vpop.xlane.xlu1 %60 }
 0x102   :  { %113 = vrcp.f32 %v61_v19  ;;  %v78_v23 = vand.u32 2147483648, %v61_v19  ;;  %v76_v25 = vand.u32 2147483647, %v61_v19  ;;  %vm72_vm2 = vweird.f32 %v61_v19 }
 0x104   :  { %v79_v27 = vor.u32 1.1754944e-38, %v78_v23  ;;  %vm77_vm4 = vcmp.eq.f32.partialorder %v76_v25, 8.507059e+37  ;;  %v66_v33 = vpop.xlane.xlu2 %65 }
 0x108   :  { %v114_v20 = vpop.eup %113 }
 0x109   :  { %v68_v21 = vmul.f32 %v114_v20, %v61_v19  ;;  %vm73_vm1 = vweird.f32 %v114_v20  ;;  %v56_v28 = vpop.xlane.xlu1 %55 }
 0x10a   :  { %vm74_vm3 = vmor %vm72_vm2, %vm73_vm1 }
 0x10b   :  { %v69_v22 = vsub.f32 1.0, %v68_v21 }
 0x10d   :  { %v70_v24 = vmul.f32 %v114_v20, %v69_v22 }
 0x10f   :  { %v71_v26 = vadd.f32 %v114_v20, %v70_v24 }
 0x111   :  { %v75_v29 = vsel %vm74_vm3, %v114_v20, %v71_v26 }
 0x112   :  { %v80_v30 = vsel %vm77_vm4, %v79_v27, %v75_v29 }
 0x113   :  { %v82_v31 = vmul.f32 %v80_v30, %v56_v28  ;;  %v81_v34 = vmul.f32 %v80_v30, %v66_v33 }
 0x115   :  { %115 = vlog2.f32 %v82_v31 }
 0x11b   :  { %v116_v32 = vpop.eup %115 }
 0x11c   :  { %v84_v35 = vmul.f32 0.6931472, %v116_v32 }
 0x11e   :  { %v85_v36 = vadd.f32 %v84_v35, %v81_v34 }
 0x120   :  { %v87_v37 = vsel %vm86_vm5, %v85_v36, 0.0 }
 0x121   :  { %88 = vadd.xlane.f32.xlu2 %v87_v37 }
 0x194   :  { %v89_v38 = vpop.xlane.xlu2 %88 }
 0x195   :  { %v90_v39 = vrot.slane %v89_v38, 4 }
 0x197   :  { %v91_v40 = vadd.f32 %v90_v39, %v89_v38 }
 0x199   :  { %v92_v41 = vrot.slane %v91_v40, 2 }
 0x19b   :  { %v93_v42 = vadd.f32 %v92_v41, %v91_v40 }
 0x19d   :  { %v94_v43 = vrot.slane %v93_v42, 1 }
 0x19f   :  { %v95_v44 = vadd.f32 %v94_v43, %v93_v42 }
 0x1a1   :  { %105 = vpush %v95_v44 }
 0x1d2   :  { %s106_s0 = spop %105 }
 0x1d3   :  { %v97_v45 = vstv %s106_s0 }
 0x1d4   :  { %98 = vst [vmem:[%s202_s2] sm:$0xff] %v97_v45 }
 0x1d5   :  { %103 = vsyncpa [#allocation3], 1 }
 0x1d6   :  { %104 = vsyncpa [#allocation5], 1 }

</bundles_post_ra>
